<compile_context>
chip_gen: v5e
topology: v5e:2x2
jax: 0.10.0
libtpu: 0.0.40
codegen_flags: <defaults>
</compile_context>

<pallas_src>
import functools

import jax
import jax.numpy as jnp
from jax.experimental import pallas as pl
from jax.experimental.pallas import tpu as pltpu

ALPHA = 0.5
LANE = 128
SUBLANE = 8


def _round_up(n, m):
    return ((n + m - 1) // m) * m


def _snake(h):
    # x + (1/alpha)*sin(alpha*x)^2  ==  x + (0.5/alpha)*(1 - cos(2*alpha*x))
    # (single EUP transcendental, one fewer VALU multiply per element)
    return h + (0.5 / ALPHA) * (1.0 - jnp.cos((2.0 * ALPHA) * h))


def fnn_kernel(x_ref, w0_ref, b0_ref, wh_ref, bh_ref, wo_ref, bo_ref, b_ref,
               o_ref, *, depth, compute_dtype):
    # First layer: (TB, Ki) @ (Ki, W) + (1, W)
    x = x_ref[...].astype(compute_dtype)
    h = jnp.dot(x, w0_ref[...], preferred_element_type=jnp.float32)
    h = _snake(h + b0_ref[...])

    # Hidden layers (depth is static -> unrolled)
    for d in range(depth):
        h = jnp.dot(h.astype(compute_dtype), wh_ref[d],
                    preferred_element_type=jnp.float32)
        h = _snake(h + bh_ref[d])          # bh_ref[d] is (1, W): no reshape

    # Output layer + extra bias parameter self.b
    out = jnp.dot(h.astype(compute_dtype), wo_ref[...],
                  preferred_element_type=jnp.float32)
    o_ref[...] = (out + bo_ref[...] + b_ref[...]).astype(o_ref.dtype)


def init_params(key, num_input, num_output, depth, width):
    """Deterministic init mimicking nn.Linear default (uniform +/- 1/sqrt(fan_in)).
    Weights stored as (in, out) so the kernel computes x @ W (same math as x @ W.T
    for PyTorch's (out, in) storage)."""
    ks = jax.random.split(key, 6)

    def unif(k, shape, fan_in):
        bound = 1.0 / jnp.sqrt(fan_in)
        return jax.random.uniform(k, shape, jnp.float32, -bound, bound)

    return {
        "w0": unif(ks[0], (num_input, width), num_input),
        "b0": unif(ks[1], (1, width), num_input),
        "wh": unif(ks[2], (depth, width, width), width),
        "bh": unif(ks[3], (depth, width), width),
        "wo": unif(ks[4], (width, num_output), width),
        "bo": unif(ks[5], (1, num_output), width),
        "b": jnp.zeros((1, num_output), jnp.float32),   # Parameter self.b (zeros)
    }


def prepare_params(params, *, compute_dtype=jnp.float32):
    """Zero-pad feature dims to multiples of 128 lanes and (optionally) cast the
    matmul weights to bf16. Biases stay f32. Padded rows/cols are zero so the
    unpadded output slice is exact (Snake(0) == 0)."""
    w0, b0 = params["w0"], params["b0"]
    wh, bh = params["wh"], params["bh"]
    wo, bo, b = params["wo"], params["bo"], params["b"]

    num_input, width = w0.shape
    depth = wh.shape[0]
    num_output = wo.shape[1]

    ki = _round_up(num_input, LANE)
    wp = _round_up(width, LANE)
    np_ = _round_up(num_output, LANE)

    def pad2(a, r, c):
        return jnp.pad(a, ((0, r - a.shape[0]), (0, c - a.shape[1])))

    dh = max(depth, 1)  # keep a non-empty array even for depth == 0
    wh_p = jnp.zeros((dh, wp, wp), jnp.float32).at[:depth, :width, :width].set(wh)
    bh_p = jnp.zeros((dh, 1, wp), jnp.float32).at[:depth, 0, :width].set(bh)

    prepped = {
        "w0": pad2(w0, ki, wp).astype(compute_dtype),
        "b0": pad2(b0, 1, wp),
        "wh": wh_p.astype(compute_dtype),
        "bh": bh_p,
        "wo": pad2(wo, wp, np_).astype(compute_dtype),
        "bo": pad2(bo, 1, np_),
        "b": pad2(b, 1, np_),
    }
    meta = dict(num_input=num_input, width=width, num_output=num_output,
                depth=depth, ki=ki, wp=wp, np=np_, compute_dtype=compute_dtype)
    return prepped, meta


def fnn_forward(x, prepped, meta, *, tb=None):
    """x: (B, num_input) float32. prepped/meta from prepare_params."""
    B, ni = x.shape
    ki, wp, np_ = meta["ki"], meta["wp"], meta["np"]
    depth = meta["depth"]
    num_output = meta["num_output"]
    compute_dtype = meta["compute_dtype"]

    # Batch tile: multiple of 8 sublanes; 256 rows for realistic batches.
    if tb is None:
        tb = 256 if B >= 256 else _round_up(B, SUBLANE)
    tb = max(SUBLANE, _round_up(tb, SUBLANE))
    b_pad = _round_up(B, tb)

    # Zero-pad batch rows and input feature columns (padded cols hit zero weight rows).
    xp = jnp.zeros((b_pad, ki), jnp.float32).at[:B, :ni].set(x)

    grid = (b_pad // tb,)

    def const2(i):
        return (0, 0)

    def const3(i):
        return (0, 0, 0)

    in_specs = [
        pl.BlockSpec((tb, ki), lambda i: (i, 0)),          # x: batch-tiled
        pl.BlockSpec(prepped["w0"].shape, const2),         # weights: VMEM-resident
        pl.BlockSpec(prepped["b0"].shape, const2),
        pl.BlockSpec(prepped["wh"].shape, const3),
        pl.BlockSpec(prepped["bh"].shape, const3),
        pl.BlockSpec(prepped["wo"].shape, const2),
        pl.BlockSpec(prepped["bo"].shape, const2),
        pl.BlockSpec(prepped["b"].shape, const2),
    ]
    out_spec = pl.BlockSpec((tb, np_), lambda i: (i, 0))   # lane-dense (np_ % 128 == 0)

    # Cost estimate for the XLA scheduler.
    flops = 2 * b_pad * (ki * wp + depth * wp * wp + wp * np_)
    transcendentals = b_pad * wp * (depth + 1)
    param_bytes = sum(int(a.size) * a.dtype.itemsize for a in prepped.values())
    bytes_accessed = int(xp.size) * 4 + param_bytes + b_pad * np_ * 4

    # VMEM budget: resident weights + double-buffered x/out tiles + live h + headroom.
    tile_bytes = 2 * (tb * ki * 4 + tb * np_ * 4)
    live_bytes = 4 * tb * wp * 4
    need = param_bytes + tile_bytes + live_bytes + (2 << 20)
    vmem_limit = int(min(max(2 * need, 32 << 20), 128 << 20))

    kernel = functools.partial(fnn_kernel, depth=depth, compute_dtype=compute_dtype)

    out = pl.pallas_call(
        kernel,
        out_shape=jax.ShapeDtypeStruct((b_pad, np_), jnp.float32),
        grid=grid,
        in_specs=in_specs,
        out_specs=out_spec,
        compiler_params=pltpu.CompilerParams(
            dimension_semantics=("parallel",),   # batch axis -> megacore/2-TC shard
            vmem_limit_bytes=vmem_limit),
        cost_estimate=pl.CostEstimate(
            flops=flops,
            transcendentals=transcendentals,
            bytes_accessed=bytes_accessed),
    )(xp, prepped["w0"], prepped["b0"], prepped["wh"], prepped["bh"],
      prepped["wo"], prepped["bo"], prepped["b"])

    return out[:B, :num_output]


def fnn_reference(x, params, *, depth):
    """Pure-JAX reference (original sin^2 Snake form) for correctness checking."""
    def snake(h):
        return h + (1.0 / ALPHA) * jnp.sin(ALPHA * h) ** 2

    h = snake(x @ params["w0"] + params["b0"])
    for d in range(depth):
        h = snake(h @ params["wh"][d] + params["bh"][d][None, :])
    return h @ params["wo"] + params["bo"] + params["b"]


if __name__ == "__main__":
    num_input, num_output, depth, width = 4, 16, 2, 32
    batch = 8

    key = jax.random.PRNGKey(0)
    k_params, k_x = jax.random.split(key)
    params = init_params(k_params, num_input, num_output, depth, width)
    x = jax.random.normal(k_x, (batch, num_input), jnp.float32)

    ref = fnn_reference(x, params, depth=depth)

    # f32 matmul path (bit-tight correctness).
    pp32, meta32 = prepare_params(params, compute_dtype=jnp.float32)
    out32 = jax.block_until_ready(fnn_forward(x, pp32, meta32))
    assert out32.shape == (batch, num_output)
    assert jnp.allclose(out32, ref, atol=1e-5, rtol=1e-5)

    # bf16-weight path (MXU-native on v6e/v7x), f32 accumulation -> looser tolerance.
    ppbf, metabf = prepare_params(params, compute_dtype=jnp.bfloat16)
    outbf = jax.block_until_ready(fnn_forward(x, ppbf, metabf))
    assert outbf.shape == (batch, num_output)
    assert jnp.allclose(outbf, ref, atol=5e-2, rtol=5e-2)

    print("KERNEL_OK")
</pallas_src>

<mosaic_0001>
module attributes {stable_mosaic.version = 11 : i64} {
  func.func @fnn_kernel(%arg0: i32, %arg1: memref<8x128xf32, #tpu.memory_space<vmem>>, %arg2: memref<128x128xf32, #tpu.memory_space<vmem>>, %arg3: memref<1x128xf32, #tpu.memory_space<vmem>>, %arg4: memref<2x128x128xf32, #tpu.memory_space<vmem>>, %arg5: memref<2x1x128xf32, #tpu.memory_space<vmem>>, %arg6: memref<128x128xf32, #tpu.memory_space<vmem>>, %arg7: memref<1x128xf32, #tpu.memory_space<vmem>>, %arg8: memref<1x128xf32, #tpu.memory_space<vmem>>, %arg9: memref<8x128xf32, #tpu.memory_space<vmem>>) attributes {dimension_semantics = [#tpu.dimension_semantics<parallel>], iteration_bounds = array<i64: 1>, scalar_prefetch = 0 : i64, scratch_operands = 0 : i64, tpu.core_type = #tpu.core_type<tc>, window_params = [{transform_indices = @transform_0, window_bounds = array<i64: 8, 128>}, {pipeline_mode = #tpu.pipeline_mode<synchronous>, transform_indices = @transform_1, window_bounds = array<i64: 128, 128>}, {pipeline_mode = #tpu.pipeline_mode<synchronous>, transform_indices = @transform_2, window_bounds = array<i64: 1, 128>}, {pipeline_mode = #tpu.pipeline_mode<synchronous>, transform_indices = @transform_3, window_bounds = array<i64: 2, 128, 128>}, {pipeline_mode = #tpu.pipeline_mode<synchronous>, transform_indices = @transform_4, window_bounds = array<i64: 2, 1, 128>}, {pipeline_mode = #tpu.pipeline_mode<synchronous>, transform_indices = @transform_5, window_bounds = array<i64: 128, 128>}, {pipeline_mode = #tpu.pipeline_mode<synchronous>, transform_indices = @transform_6, window_bounds = array<i64: 1, 128>}, {pipeline_mode = #tpu.pipeline_mode<synchronous>, transform_indices = @transform_7, window_bounds = array<i64: 1, 128>}, {transform_indices = @transform_8, window_bounds = array<i64: 8, 128>}]} {
    %c0 = arith.constant 0 : index
    %c0_0 = arith.constant 0 : index
    %0 = vector.load %arg1[%c0, %c0_0] : memref<8x128xf32, #tpu.memory_space<vmem>>, vector<8x128xf32>
    %c0_1 = arith.constant 0 : index
    %c0_2 = arith.constant 0 : index
    %1 = vector.load %arg2[%c0_1, %c0_2] : memref<128x128xf32, #tpu.memory_space<vmem>>, vector<128x128xf32>
    %cst = arith.constant dense<0.000000e+00> : vector<8x128xf32>
    %2 = tpu.matmul %0, %1, %cst {dimension_numbers = #tpu.dot_dimension_numbers<[1], [0], [0], [1], [0, 0, 1, 1], [], []>} : vector<8x128xf32>, vector<128x128xf32>, vector<8x128xf32> -> vector<8x128xf32>
    %c0_3 = arith.constant 0 : index
    %c0_4 = arith.constant 0 : index
    %3 = vector.load %arg3[%c0_3, %c0_4] : memref<1x128xf32, #tpu.memory_space<vmem>>, vector<1x128xf32>
    %4 = vector.broadcast %3 : vector<1x128xf32> to vector<8x128xf32>
    %5 = arith.addf %2, %4 : vector<8x128xf32>
    %cst_5 = arith.constant 1.000000e+00 : f32
    %6 = vector.broadcast %cst_5 : f32 to vector<8x128xf32>
    %7 = arith.mulf %6, %5 : vector<8x128xf32>
    %8 = math.cos %7 : vector<8x128xf32>
    %cst_6 = arith.constant 1.000000e+00 : f32
    %9 = vector.broadcast %cst_6 : f32 to vector<8x128xf32>
    %10 = arith.subf %9, %8 : vector<8x128xf32>
    %cst_7 = arith.constant 1.000000e+00 : f32
    %11 = vector.broadcast %cst_7 : f32 to vector<8x128xf32>
    %12 = arith.mulf %11, %10 : vector<8x128xf32>
    %13 = arith.addf %5, %12 : vector<8x128xf32>
    %c0_8 = arith.constant 0 : index
    %c0_9 = arith.constant 0 : index
    %c0_10 = arith.constant 0 : index
    %14 = vector.load %arg4[%c0_8, %c0_9, %c0_10] : memref<2x128x128xf32, #tpu.memory_space<vmem>>, vector<1x128x128xf32>
    %15 = vector.shape_cast %14 : vector<1x128x128xf32> to vector<128x128xf32>
    %cst_11 = arith.constant dense<0.000000e+00> : vector<8x128xf32>
    %16 = tpu.matmul %13, %15, %cst_11 {dimension_numbers = #tpu.dot_dimension_numbers<[1], [0], [0], [1], [0, 0, 1, 1], [], []>} : vector<8x128xf32>, vector<128x128xf32>, vector<8x128xf32> -> vector<8x128xf32>
    %c0_12 = arith.constant 0 : index
    %c0_13 = arith.constant 0 : index
    %c0_14 = arith.constant 0 : index
    %17 = vector.load %arg5[%c0_12, %c0_13, %c0_14] : memref<2x1x128xf32, #tpu.memory_space<vmem>>, vector<1x1x128xf32>
    %18 = vector.shape_cast %17 : vector<1x1x128xf32> to vector<1x128xf32>
    %19 = vector.broadcast %18 : vector<1x128xf32> to vector<8x128xf32>
    %20 = arith.addf %16, %19 : vector<8x128xf32>
    %cst_15 = arith.constant 1.000000e+00 : f32
    %21 = vector.broadcast %cst_15 : f32 to vector<8x128xf32>
    %22 = arith.mulf %21, %20 : vector<8x128xf32>
    %23 = math.cos %22 : vector<8x128xf32>
    %cst_16 = arith.constant 1.000000e+00 : f32
    %24 = vector.broadcast %cst_16 : f32 to vector<8x128xf32>
    %25 = arith.subf %24, %23 : vector<8x128xf32>
    %cst_17 = arith.constant 1.000000e+00 : f32
    %26 = vector.broadcast %cst_17 : f32 to vector<8x128xf32>
    %27 = arith.mulf %26, %25 : vector<8x128xf32>
    %28 = arith.addf %20, %27 : vector<8x128xf32>
    %c1 = arith.constant 1 : index
    %c0_18 = arith.constant 0 : index
    %c0_19 = arith.constant 0 : index
    %29 = vector.load %arg4[%c1, %c0_18, %c0_19] : memref<2x128x128xf32, #tpu.memory_space<vmem>>, vector<1x128x128xf32>
    %30 = vector.shape_cast %29 : vector<1x128x128xf32> to vector<128x128xf32>
    %cst_20 = arith.constant dense<0.000000e+00> : vector<8x128xf32>
    %31 = tpu.matmul %28, %30, %cst_20 {dimension_numbers = #tpu.dot_dimension_numbers<[1], [0], [0], [1], [0, 0, 1, 1], [], []>} : vector<8x128xf32>, vector<128x128xf32>, vector<8x128xf32> -> vector<8x128xf32>
    %c1_21 = arith.constant 1 : index
    %c0_22 = arith.constant 0 : index
    %c0_23 = arith.constant 0 : index
    %32 = vector.load %arg5[%c1_21, %c0_22, %c0_23] : memref<2x1x128xf32, #tpu.memory_space<vmem>>, vector<1x1x128xf32>
    %33 = vector.shape_cast %32 : vector<1x1x128xf32> to vector<1x128xf32>
    %34 = vector.broadcast %33 : vector<1x128xf32> to vector<8x128xf32>
    %35 = arith.addf %31, %34 : vector<8x128xf32>
    %cst_24 = arith.constant 1.000000e+00 : f32
    %36 = vector.broadcast %cst_24 : f32 to vector<8x128xf32>
    %37 = arith.mulf %36, %35 : vector<8x128xf32>
    %38 = math.cos %37 : vector<8x128xf32>
    %cst_25 = arith.constant 1.000000e+00 : f32
    %39 = vector.broadcast %cst_25 : f32 to vector<8x128xf32>
    %40 = arith.subf %39, %38 : vector<8x128xf32>
    %cst_26 = arith.constant 1.000000e+00 : f32
    %41 = vector.broadcast %cst_26 : f32 to vector<8x128xf32>
    %42 = arith.mulf %41, %40 : vector<8x128xf32>
    %43 = arith.addf %35, %42 : vector<8x128xf32>
    %c0_27 = arith.constant 0 : index
    %c0_28 = arith.constant 0 : index
    %44 = vector.load %arg6[%c0_27, %c0_28] : memref<128x128xf32, #tpu.memory_space<vmem>>, vector<128x128xf32>
    %cst_29 = arith.constant dense<0.000000e+00> : vector<8x128xf32>
    %45 = tpu.matmul %43, %44, %cst_29 {dimension_numbers = #tpu.dot_dimension_numbers<[1], [0], [0], [1], [0, 0, 1, 1], [], []>} : vector<8x128xf32>, vector<128x128xf32>, vector<8x128xf32> -> vector<8x128xf32>
    %c0_30 = arith.constant 0 : index
    %c0_31 = arith.constant 0 : index
    %46 = vector.load %arg7[%c0_30, %c0_31] : memref<1x128xf32, #tpu.memory_space<vmem>>, vector<1x128xf32>
    %47 = vector.broadcast %46 : vector<1x128xf32> to vector<8x128xf32>
    %48 = arith.addf %45, %47 : vector<8x128xf32>
    %c0_32 = arith.constant 0 : index
    %c0_33 = arith.constant 0 : index
    %49 = vector.load %arg8[%c0_32, %c0_33] : memref<1x128xf32, #tpu.memory_space<vmem>>, vector<1x128xf32>
    %50 = vector.broadcast %49 : vector<1x128xf32> to vector<8x128xf32>
    %51 = arith.addf %48, %50 : vector<8x128xf32>
    %c0_34 = arith.constant 0 : index
    %c0_35 = arith.constant 0 : index
    %52 = vector.load %arg9[%c0_34, %c0_35] : memref<8x128xf32, #tpu.memory_space<vmem>>, vector<8x128xf32>
    tpu.vector_store %arg9[%c0_34, %c0_35], %51 {strides = array<i32>} : memref<8x128xf32, #tpu.memory_space<vmem>>, vector<8x128xf32>,
    return
  }
  func.func @transform_0(%arg0: i32) -> (i32, i32) {
    %c0_i32 = arith.constant 0 : i32
    %c0_i32_0 = arith.constant 0 : i32
    return %arg0, %c0_i32 : i32, i32
  }
  func.func @transform_1(%arg0: i32) -> (i32, i32) {
    %c0_i32 = arith.constant 0 : i32
    %c0_i32_0 = arith.constant 0 : i32
    %c0_i32_1 = arith.constant 0 : i32
    return %c0_i32, %c0_i32_0 : i32, i32
  }
  func.func @transform_2(%arg0: i32) -> (i32, i32) {
    %c0_i32 = arith.constant 0 : i32
    %c0_i32_0 = arith.constant 0 : i32
    %c0_i32_1 = arith.constant 0 : i32
    return %c0_i32, %c0_i32_0 : i32, i32
  }
  func.func @transform_3(%arg0: i32) -> (i32, i32, i32) {
    %c0_i32 = arith.constant 0 : i32
    %c0_i32_0 = arith.constant 0 : i32
    %c0_i32_1 = arith.constant 0 : i32
    %c0_i32_2 = arith.constant 0 : i32
    return %c0_i32, %c0_i32_0, %c0_i32_1 : i32, i32, i32
  }
  func.func @transform_4(%arg0: i32) -> (i32, i32, i32) {
    %c0_i32 = arith.constant 0 : i32
    %c0_i32_0 = arith.constant 0 : i32
    %c0_i32_1 = arith.constant 0 : i32
    %c0_i32_2 = arith.constant 0 : i32
    return %c0_i32, %c0_i32_0, %c0_i32_1 : i32, i32, i32
  }
  func.func @transform_5(%arg0: i32) -> (i32, i32) {
    %c0_i32 = arith.constant 0 : i32
    %c0_i32_0 = arith.constant 0 : i32
    %c0_i32_1 = arith.constant 0 : i32
    return %c0_i32, %c0_i32_0 : i32, i32
  }
  func.func @transform_6(%arg0: i32) -> (i32, i32) {
    %c0_i32 = arith.constant 0 : i32
    %c0_i32_0 = arith.constant 0 : i32
    %c0_i32_1 = arith.constant 0 : i32
    return %c0_i32, %c0_i32_0 : i32, i32
  }
  func.func @transform_7(%arg0: i32) -> (i32, i32) {
    %c0_i32 = arith.constant 0 : i32
    %c0_i32_0 = arith.constant 0 : i32
    %c0_i32_1 = arith.constant 0 : i32
    return %c0_i32, %c0_i32_0 : i32, i32
  }
  func.func @transform_8(%arg0: i32) -> (i32, i32) {
    %c0_i32 = arith.constant 0 : i32
    %c0_i32_0 = arith.constant 0 : i32
    return %arg0, %c0_i32 : i32, i32
  }
}

</mosaic_0001>

<bundles_post_ra>
// kernel: tpu_custom_call.1
= control target key start
LH: loop header
LB: loop body
LE: loop exit
PB: predicated region body
PF: predicated region fallthrough
CT: control target
= control target key end

     0   :  { %13 = vsyncpa [#allocation3], 0  ;;  %s1211_s0 = inlined_call_operand.hbm [shape: f32[8,128], index: 0, kind: input, shape index: {}]   ;;  %s1212_s1 = inlined_call_operand.hbm [shape: f32[128,128], index: 1, kind: input, shape index: {}]   ;;  %s1213_s2 = inlined_call_operand.vmem [shape: f32[1,128], index: 2, kind: input, shape index: {}]   ;;  %s1214_s3 = inlined_call_operand.hbm [shape: f32[2,128,128], index: 3, kind: input, shape index: {}]   ;;  %s1215_s4 = inlined_call_operand.vmem [shape: f32[2,1,128], index: 4, kind: input, shape index: {}]   ;;  %s1216_s5 = inlined_call_operand.hbm [shape: f32[128,128], index: 5, kind: input, shape index: {}]   ;;  %s1217_s6 = inlined_call_operand.vmem [shape: f32[1,128], index: 6, kind: input, shape index: {}]   ;;  %s1218_s7 = inlined_call_operand.vmem [shape: f32[1,128], index: 7, kind: input, shape index: {}]   ;;  %s1219_s8 = inlined_call_operand.hbm [shape: f32[8,128], index: 8, kind: output, shape index: {}]  }
   0x1   :  { %14 = vsyncpa [#allocation6], 0 }
   0x2   :  { %15 = vsyncpa [#allocation9], 0  ;;  %s32_s29 = sshll.u32 %s1212_s1, 4  ;;  %s33_s29 = int_to_ptr.hbm [resolvable:$true] %s32_s29 }
   0x3   :  { %16 = vsyncpa [#allocation4], 0  ;;  %s904_s30 = smov [#allocation5]   ;;  %s22_s12 = sshll.u32 %s1211_s0, 4  ;;  %s23_s12 = int_to_ptr.hbm [resolvable:$true] %s22_s12 }
   0x4   :  { %s34_s9 = sshll.u32 %s904_s30, 4  ;;  %s905_s13 = smov 128   ;;  %s35_s9 = int_to_ptr.vmem [resolvable:$true] %s34_s9 }
   0x5   :  { %s906_s14 = smov 8   ;;  %s907_s15 = smov [#allocation2]  }
   0x6   :  { %40 = dma.hbm_to_vmem [thread:$0]  %s33_s29, 2048, %s35_s9, [#allocation6], %s905_s13, %s905_s13, %s906_s14  }
   0x7   :  { %s24_s16 = sshll.u32 %s907_s15, 4  ;;  %s47_s19 = sshll.u32 %s1214_s3, 4  ;;  %s25_s16 = int_to_ptr.vmem [resolvable:$true] %s24_s16  ;;  %s48_s19 = int_to_ptr.hbm [resolvable:$true] %s47_s19 }
   0x8   :  { %27 = dma.hbm_to_vmem [thread:$0]  %s23_s12, 128, %s25_s16, [#allocation3]  }
   0x9   :  { %s62_s21 = sshll.u32 %s1216_s5, 4  ;;  %s908_s22 = smov [#allocation7]   ;;  %s63_s21 = int_to_ptr.hbm [resolvable:$true] %s62_s21 }
   0xa   :  { %s49_s23 = sshll.u32 %s908_s22, 4  ;;  %s909_s0 = smov [#allocation8]   ;;  %s50_s23 = int_to_ptr.vmem [resolvable:$true] %s49_s23 }
   0xb   :  { %55 = dma.hbm_to_vmem [thread:$0]  %s48_s19, 4096, %s50_s23, [#allocation6], %s905_s13, %s905_s13, %s906_s14  }
   0xc   :  { %s64_s24 = sshll.u32 %s909_s0, 4  ;;  %s65_s24 = int_to_ptr.vmem [resolvable:$true] %s64_s24 }
   0xd   :  { %70 = dma.hbm_to_vmem [thread:$0]  %s63_s21, 2048, %s65_s24, [#allocation9], %s905_s13, %s905_s13, %s906_s14  }
   0xe   :  { %896 = dma.done.wait [#allocation3], 128  }
   0xf   :  { %897 = vsyncadd [#allocation3], 4294967168 }
  0x10   :  { %898 = dma.done.wait [#allocation6], 6144  }
  0x11   :  { %899 = vsyncadd [#allocation6], 4294961152 }
  0x12   :  { %900 = dma.done.wait [#allocation9], 2048  }
  0x13   :  { %901 = vsyncadd [#allocation9], 4294965248  ;;  %v107_v0 = vld [vmem:[#allocation5 + $0x78] sm:$0xff]  ;;  %v106_v1 = vld [vmem:[#allocation5 + $0x70] sm:$0xff]  ;;  %v910_v47 = vmov 683565275  }
  0x14   :  { %112 = vmatpush.msra.mxu0 %v107_v0  ;;  %v105_v2 = vld [vmem:[#allocation5 + $0x68] sm:$0xff]  ;;  %v104_v3 = vld [vmem:[#allocation5 + $0x60] sm:$0xff]  ;;  %v103_v4 = vld [vmem:[#allocation5 + $0x58] sm:$0xff]  ;;  %v911_v49 = vmov 2475754826   ;;  %s917_s9 = smov [#allocation10]  }
  0x15   :  { %v102_v5 = vld [vmem:[#allocation5 + $0x50] sm:$0xff]  ;;  %v101_v6 = vld [vmem:[#allocation5 + $0x48] sm:$0xff]  ;;  %v100_v7 = vld [vmem:[#allocation5 + $0x40] sm:$0xff]  ;;  %v912_v52 = vmov 2131351028   ;;  %s733_s10 = sshll.u32 %s917_s9, 4  ;;  %s734_s10 = int_to_ptr.vmem [resolvable:$true] %s733_s10 }
  0x16   :  { %113 = vmatpush.msra.mxu0 %v106_v1  ;;  %v99_v8 = vld [vmem:[#allocation5 + $0x38] sm:$0xff]  ;;  %v98_v9 = vld [vmem:[#allocation5 + $0x30] sm:$0xff]  ;;  %v97_v10 = vld [vmem:[#allocation5 + $0x28] sm:$0xff]  ;;  %v913_v55 = vmov 2102212464   ;;  %s735_s13 = sshll.u32 %s1219_s8, 4  ;;  %s736_s13 = int_to_ptr.hbm [resolvable:$true] %s735_s13 }
  0x17   :  { %v96_v11 = vld [vmem:[#allocation5 + $0x20] sm:$0xff]  ;;  %v95_v12 = vld [vmem:[#allocation5 + $0x18] sm:$0xff]  ;;  %v94_v13 = vld [vmem:[#allocation5 + $0x10] sm:$0xff]  ;;  %v914_v58 = vmov 920167782  }
  0x18   :  { %114 = vmatpush.msra.mxu0 %v105_v2  ;;  %v93_v14 = vld [vmem:[#allocation5 + $0x8] sm:$0xff]  ;;  %v92_v15 = vld [vmem:[#allocation5] sm:$0xff]  ;;  %v91_v16 = vld [vmem:[#allocation2] sm:$0xff]  ;;  %v915_v61 = vmov 1326507024  }
  0x19   :  { %v303_v17 = vld [vmem:[#allocation7 + $0x78] sm:$0xff]  ;;  %v302_v18 = vld [vmem:[#allocation7 + $0x70] sm:$0xff]  ;;  %v301_v19 = vld [vmem:[#allocation7 + $0x68] sm:$0xff] }
  0x1a   :  { %115 = vmatpush.msra.mxu0 %v104_v3  ;;  %308 = vmatpush.msra.mxu1 %v303_v17  ;;  %v300_v20 = vld [vmem:[#allocation7 + $0x60] sm:$0xff]  ;;  %v299_v21 = vld [vmem:[#allocation7 + $0x58] sm:$0xff]  ;;  %v298_v22 = vld [vmem:[#allocation7 + $0x50] sm:$0xff] }
  0x1b   :  { %v297_v23 = vld [vmem:[#allocation7 + $0x48] sm:$0xff]  ;;  %v296_v24 = vld [vmem:[#allocation7 + $0x40] sm:$0xff]  ;;  %v771_v25 = vld [vmem:[%s1213_s2] ss:$0 sm:$0xff] }
  0x1c   :  { %116 = vmatpush.msra.mxu0 %v103_v4  ;;  %309 = vmatpush.msra.mxu1 %v302_v18  ;;  %v295_v26 = vld [vmem:[#allocation7 + $0x38] sm:$0xff]  ;;  %v294_v27 = vld [vmem:[#allocation7 + $0x30] sm:$0xff]  ;;  %v293_v30 = vld [vmem:[#allocation7 + $0x28] sm:$0xff] }
  0x1d   :  { %v292_v32 = vld [vmem:[#allocation7 + $0x20] sm:$0xff]  ;;  %v291_v34 = vld [vmem:[#allocation7 + $0x18] sm:$0xff]  ;;  %v290_v36 = vld [vmem:[#allocation7 + $0x10] sm:$0xff] }
  0x1e   :  { %117 = vmatpush.msra.mxu0 %v102_v5  ;;  %310 = vmatpush.msra.mxu1 %v301_v19  ;;  %v289_v39 = vld [vmem:[#allocation7 + $0x8] sm:$0xff]  ;;  %v288_v40 = vld [vmem:[#allocation7] sm:$0xff] }
  0x20   :  { %118 = vmatpush.msra.mxu0 %v101_v6  ;;  %311 = vmatpush.msra.mxu1 %v300_v20 }
  0x22   :  { %119 = vmatpush.msra.mxu0 %v100_v7  ;;  %312 = vmatpush.msra.mxu1 %v299_v21 }
  0x24   :  { %120 = vmatpush.msra.mxu0 %v99_v8  ;;  %313 = vmatpush.msra.mxu1 %v298_v22 }
  0x26   :  { %121 = vmatpush.msra.mxu0 %v98_v9  ;;  %314 = vmatpush.msra.mxu1 %v297_v23 }
  0x28   :  { %122 = vmatpush.msra.mxu0 %v97_v10  ;;  %315 = vmatpush.msra.mxu1 %v296_v24 }
  0x2a   :  { %123 = vmatpush.msra.mxu0 %v96_v11  ;;  %316 = vmatpush.msra.mxu1 %v295_v26 }
  0x2c   :  { %124 = vmatpush.msra.mxu0 %v95_v12  ;;  %317 = vmatpush.msra.mxu1 %v294_v27 }
  0x2e   :  { %125 = vmatpush.msra.mxu0 %v94_v13  ;;  %318 = vmatpush.msra.mxu1 %v293_v30 }
  0x30   :  { %126 = vmatpush.msra.mxu0 %v93_v14  ;;  %319 = vmatpush.msra.mxu1 %v292_v32  ;;  %v916_v32 = vmov 0  }
  0x32   :  { %127 = vmatpush.msra.mxu0 %v92_v15  ;;  %320 = vmatpush.msra.mxu1 %v291_v34 }
  0x33   :  { %128 = vmatmul.f32.vlgmr.msra.gmra.mxu0 %v91_v16 }
  0x34   :  { %321 = vmatpush.msra.mxu1 %v290_v36 }
  0x36   :  { %322 = vmatpush.msra.mxu1 %v289_v39 }
  0x38   :  { %323 = vmatpush.msra.mxu1 %v288_v40 }
  0xb0   :  { %v129_v28 = vpop.f32.mrf.mxu0 }
  0xb1   :  { %v978_v29 = vadd.f32 %v771_v25, %v129_v28 }
  0xb3   :  { %v135_v31 = vand.u32 2139095040, %v978_v29  ;;  %v132_v37 = vand.u32 2147483647, %v978_v29  ;;  %vm134_vm12 = vcmp.lt.s32.totalorder %v978_v29, 0 }
  0xb5   :  { %v136_v33 = vshrl.u32 %v135_v31, 23  ;;  %v139_v42 = vand.u32 8388607, %v132_v37  ;;  %vm1045_vm13 = vcmp.le.f32.partialorder %v132_v37, 0.7853982 }
  0xb7   :  { %v747_v35 = vadd.s32 4294967169, %v136_v33  ;;  %v140_v46 = vor.u32 8388608, %v139_v42 }
  0xb9   :  { %v142_v38 = vadd.s32 1, %v747_v35  ;;  %v1004_v4 = vshll.u32 %v140_v46, 8 }
  0xbb   :  { %vm143_vm0 = vcmp.gt.s32.totalorder %v142_v38, 0  ;;  %v181_v13 = vand.u32 65535, %v1004_v4  ;;  %v182_v14 = vshrl.u32 %v1004_v4, 16 }
  0xbc   :  { %v144_v41 = vsel %vm143_vm0, %v142_v38, 0 }
  0xbd   :  { %v146_v43 = vand.u32 31, %v144_v41  ;;  %v986_v45 = vshrl.u32 %v144_v41, 5 }
  0xbf   :  { %v984_v44 = vsub.s32 32, %v146_v43  ;;  %v149_v48 = vshll.u32 %v910_v47, %v146_v43  ;;  %v152_v50 = vshll.u32 %v911_v49, %v146_v43  ;;  %v155_v54 = vshll.u32 %v912_v52, %v146_v43 }
  0xc0   :  { %v158_v57 = vshll.u32 %v913_v55, %v146_v43  ;;  %v161_v60 = vshll.u32 %v914_v58, %v146_v43  ;;  %vm164_vm1 = vcmp.lt.s32.totalorder %v986_v45, 1  ;;  %vm167_vm2 = vcmp.lt.s32.totalorder %v986_v45, 4 }
  0xc1   :  { %v150_v51 = vshrl.u32 %v911_v49, %v984_v44  ;;  %v153_v53 = vshrl.u32 %v912_v52, %v984_v44  ;;  %v156_v56 = vshrl.u32 %v913_v55, %v984_v44  ;;  %v159_v59 = vshrl.u32 %v914_v58, %v984_v44 }
  0xc2   :  { %v162_v62 = vshrl.u32 %v915_v61, %v984_v44  ;;  %vm166_vm3 = vcmp.lt.s32.totalorder %v986_v45, 3  ;;  %vm165_vm4 = vcmp.lt.s32.totalorder %v986_v45, 2  ;;  %v148_v42 = vshrl.u32 %v910_v47, %v984_v44 }
  0xc3   :  { %v151_v63 = vor.u32 %v150_v51, %v149_v48  ;;  %v154_v0 = vor.u32 %v153_v53, %v152_v50  ;;  %v157_v1 = vor.u32 %v156_v56, %v155_v54  ;;  %v160_v2 = vor.u32 %v159_v59, %v158_v57 }
  0xc4   :  { %v163_v3 = vor.u32 %v162_v62, %v161_v60 }
  0xc5   :  { %v172_v5 = vsel %vm164_vm1, %v151_v63, %v154_v0  ;;  %v176_v6 = vsel %vm164_vm1, %v154_v0, %v157_v1  ;;  %v173_v7 = vsel %vm167_vm2, %v160_v2, 920167782  ;;  %v169_v39 = vsel %vm167_vm2, %v157_v1, 2102212464 }
  0xc6   :  { %v177_v8 = vsel %vm167_vm2, %v163_v3, 1326507024  ;;  %v174_v9 = vsel %vm166_vm3, %v157_v1, %v173_v7  ;;  %v168_v53 = vsel %vm164_vm1, %v148_v42, %v151_v63  ;;  %v170_v54 = vsel %vm166_vm3, %v154_v0, %v169_v39 }
  0xc7   :  { %v178_v10 = vsel %vm166_vm3, %v160_v2, %v177_v8  ;;  %v175_v11 = vsel %vm165_vm4, %v172_v5, %v174_v9  ;;  %v171_v44 = vsel %vm165_vm4, %v168_v53, %v170_v54  ;;  %vm275_vm1 = vweird.f32 %v978_v29 }
  0xc8   :  { %v179_v12 = vsel %vm165_vm4, %v176_v6, %v178_v10  ;;  %v205_v17 = vand.u32 65535, %v175_v11  ;;  %v206_v18 = vshrl.u32 %v175_v11, 16  ;;  %v225_v5 = vmul.u32 %v1004_v4, %v171_v44 }
  0xc9   :  { %v183_v15 = vand.u32 65535, %v179_v12  ;;  %v184_v16 = vshrl.u32 %v179_v12, 16 }
  0xca   :  { %v208_v21 = vmul.u32 %v206_v18, %v181_v13  ;;  %v209_v22 = vmul.u32 %v205_v17, %v182_v14  ;;  %v207_v26 = vmul.u32 %v205_v17, %v181_v13  ;;  %v210_v31 = vmul.u32 %v206_v18, %v182_v14 }
  0xcb   :  { %v186_v19 = vmul.u32 %v184_v16, %v181_v13  ;;  %v187_v20 = vmul.u32 %v183_v15, %v182_v14  ;;  %v185_v23 = vmul.u32 %v183_v15, %v181_v13  ;;  %v188_v25 = vmul.u32 %v184_v16, %v182_v14 }
  0xcc   :  { %v211_v27 = vshll.u32 %v208_v21, 16  ;;  %v213_v34 = vshll.u32 %v209_v22, 16  ;;  %v212_v50 = vshrl.u32 %v208_v21, 16  ;;  %v214_v59 = vshrl.u32 %v209_v22, 16 }
  0xcd   :  { %v189_v24 = vshll.u32 %v186_v19, 16  ;;  %v191_v28 = vshll.u32 %v187_v20, 16  ;;  %v190_v43 = vshrl.u32 %v186_v19, 16  ;;  %v192_v56 = vshrl.u32 %v187_v20, 16 }
  0xce   :  { %vm215_vm6 = vc.u32 %v207_v26, %v211_v27  ;;  %v217_v35 = vadd.s32 %v211_v27, %v207_v26 }
  0xcf   :  { %vm193_vm5 = vc.u32 %v185_v23, %v189_v24  ;;  %v195_v30 = vadd.s32 %v189_v24, %v185_v23  ;;  %v216_v38 = vsel %vm215_vm6, 1, %v916_v32 }
  0xd0   :  { %v194_v33 = vsel %vm193_vm5, 1, %v916_v32  ;;  %v218_v41 = vadd.s32 %v216_v38, %v210_v31  ;;  %vm219_vm8 = vc.u32 %v217_v35, %v213_v34  ;;  %v221_v1 = vadd.s32 %v217_v35, %v213_v34 }
  0xd1   :  { %v196_v36 = vadd.s32 %v194_v33, %v188_v25  ;;  %vm197_vm7 = vc.u32 %v195_v30, %v191_v28  ;;  %v220_v48 = vsel %vm219_vm8, 1, %v916_v32 }
  0xd2   :  { %v198_v40 = vsel %vm197_vm7, 1, %v916_v32  ;;  %v222_v51 = vadd.s32 %v220_v48, %v218_v41 }
  0xd3   :  { %v200_v46 = vadd.s32 %v198_v40, %v196_v36 }
  0xd4   :  { %v223_v60 = vadd.s32 %v222_v51, %v212_v50 }
  0xd5   :  { %v201_v57 = vadd.s32 %v200_v46, %v190_v43 }
  0xd6   :  { %v224_v2 = vadd.s32 %v223_v60, %v214_v59 }
  0xd7   :  { %v202_v62 = vadd.s32 %v201_v57, %v192_v56 }
  0xd8   :  { %v228_v3 = vadd.s32 1, %v224_v2 }
  0xd9   :  { %vm227_vm9 = vc.u32 %v202_v62, %v221_v1  ;;  %v226_v45 = vadd.s32 %v221_v1, %v202_v62 }
  0xda   :  { %v229_v6 = vsel %vm227_vm9, %v228_v3, %v224_v2  ;;  %v500_v2 = vld [vmem:[#allocation7 + $0xf8] sm:$0xff]  ;;  %v499_v3 = vld [vmem:[#allocation7 + $0xf0] sm:$0xff] }
  0xdb   :  { %v230_v7 = vadd.s32 %v229_v6, %v225_v5  ;;  %506 = vmatpush.msra.mxu2 %v500_v2  ;;  %v498_v5 = vld [vmem:[#allocation7 + $0xe8] sm:$0xff]  ;;  %v497_v6 = vld [vmem:[#allocation7 + $0xe0] sm:$0xff] }
  0xdd   :  { %v231_v63 = vadd.s32 536870912, %v230_v7  ;;  %507 = vmatpush.msra.mxu2 %v499_v3 }
  0xdf   :  { %v232_v8 = vshrl.u32 %v231_v63, 30  ;;  %508 = vmatpush.msra.mxu2 %v498_v5  ;;  %v495_v63 = vld [vmem:[#allocation7 + $0xd0] sm:$0xff] }
  0xe1   :  { %v233_v9 = vshll.u32 %v232_v8, 30  ;;  %v256_v34 = vsub.s32 4, %v232_v8  ;;  %509 = vmatpush.msra.mxu2 %v497_v6 }
  0xe3   :  { %v234_v0 = vsub.s32 %v230_v7, %v233_v9  ;;  %v257_v40 = vsel %vm134_vm12, %v256_v34, %v232_v8  ;;  %v496_v7 = vld [vmem:[#allocation7 + $0xd8] sm:$0xff]  ;;  %v494_v8 = vld [vmem:[#allocation7 + $0xc8] sm:$0xff]  ;;  %v493_v9 = vld [vmem:[#allocation7 + $0xc0] sm:$0xff] }
  0xe4   :  { %v259_v37 = vsel %vm1045_vm13, 0, %v257_v40  ;;  %510 = vmatpush.msra.mxu2 %v496_v7 }
  0xe5   :  { %vm235_vm10 = vcmp.lt.s32.totalorder %v234_v0, 0  ;;  %v236_v10 = vsub.s32 0, %v234_v0  ;;  %v276_v51 = vand.u32 3, %v259_v37 }
  0xe6   :  { %511 = vmatpush.msra.mxu2 %v495_v63 }
  0xe7   :  { %v237_v11 = vsel %vm235_vm10, %v236_v10, %v234_v0  ;;  %vm278_vm14 = vcmp.eq.s32.totalorder %v276_v51, 0  ;;  %vm281_vm15 = vcmp.eq.s32.totalorder %v276_v51, 2  ;;  %vm277_vm0 = vcmp.lt.s32.totalorder %v276_v51, 2  ;;  %v491_v10 = vld [vmem:[#allocation7 + $0xb0] sm:$0xff] }
  0xe8   :  { %v238_v12 = vclz %v237_v11  ;;  %512 = vmatpush.msra.mxu2 %v494_v8 }
  0xea   :  { %v748_v13 = vadd.s32 4294967294, %v238_v12  ;;  %513 = vmatpush.msra.mxu2 %v493_v9 }
  0xec   :  { %vm749_vm11 = vcmp.lt.s32.totalorder %v748_v13, 0 }
  0xed   :  { %v241_v14 = vsel %vm749_vm11, 0, %v748_v13  ;;  %v490_v13 = vld [vmem:[#allocation7 + $0xa8] sm:$0xff] }
  0xee   :  { %v242_v15 = vsub.s32 32, %v241_v14  ;;  %v246_v16 = vsub.s32 4294967266, %v241_v14  ;;  %v243_v17 = vshll.u32 %v234_v0, %v241_v14  ;;  %v492_v0 = vld [vmem:[#allocation7 + $0xb8] sm:$0xff] }
  0xef   :  { %514 = vmatpush.msra.mxu2 %v492_v0 }
  0xf0   :  { %v244_v18 = vshrl.u32 %v226_v45, %v242_v15  ;;  %v247_v19 = vadd.s32 127, %v246_v16  ;;  %v489_v45 = vld [vmem:[#allocation7 + $0xa0] sm:$0xff]  ;;  %v488_v16 = vld [vmem:[#allocation7 + $0x98] sm:$0xff] }
  0xf1   :  { %515 = vmatpush.msra.mxu2 %v491_v10 }
  0xf2   :  { %v245_v4 = vor.u32 %v244_v18, %v243_v17  ;;  %v248_v20 = vshll.u32 %v247_v19, 23  ;;  %v487_v18 = vld [vmem:[#allocation7 + $0x90] sm:$0xff] }
  0xf3   :  { %516 = vmatpush.msra.mxu2 %v490_v13 }
  0xf4   :  { %v249_v21 = vor.u32 4788187, %v248_v20  ;;  %v252_v23 = vcvt.s32.f32 %v245_v4  ;;  %v486_v20 = vld [vmem:[#allocation7 + $0x88] sm:$0xff] }
  0xf5   :  { %517 = vmatpush.msra.mxu2 %v489_v45 }
  0xf6   :  { %v250_v22 = vand.u32 2147483647, %v249_v21  ;;  %v485_v21 = vld [vmem:[#allocation7 + $0x80] sm:$0xff] }
  0xf7   :  { %518 = vmatpush.msra.mxu2 %v488_v16 }
  0xf8   :  { %v253_v24 = vmul.f32 %v252_v23, %v250_v22 }
  0xf9   :  { %519 = vmatpush.msra.mxu2 %v487_v18 }
  0xfa   :  { %v254_v25 = vxor.u32 2147483648, %v253_v24 }
  0xfb   :  { %520 = vmatpush.msra.mxu2 %v486_v20 }
  0xfc   :  { %v255_v27 = vsel %vm134_vm12, %v254_v25, %v253_v24 }
  0xfd   :  { %v258_v28 = vsel %vm1045_vm13, %v978_v29, %v255_v27  ;;  %521 = vmatpush.msra.mxu2 %v485_v21 }
  0xfe   :  { %v260_v30 = vmul.f32 %v258_v28, %v258_v28 }
 0x100   :  { %v261_v31 = vmul.f32 -0.001358992, %v260_v30  ;;  %v268_v33 = vmul.f32 -0.00019511016, %v260_v30 }
 0x102   :  { %v262_v35 = vadd.f32 0.041655596, %v261_v31  ;;  %v269_v36 = vadd.f32 0.008332121, %v268_v33 }
 0x104   :  { %v263_v38 = vmul.f32 %v262_v35, %v260_v30  ;;  %v270_v39 = vmul.f32 %v269_v36, %v260_v30 }
 0x106   :  { %v264_v41 = vadd.f32 -0.4999988, %v263_v38  ;;  %v271_v42 = vadd.f32 -0.16666654, %v270_v39 }
 0x108   :  { %v265_v43 = vmul.f32 %v264_v41, %v260_v30  ;;  %v272_v46 = vmul.f32 %v271_v42, %v260_v30 }
 0x10a   :  { %v266_v48 = vadd.f32 1.0, %v265_v43  ;;  %v273_v50 = vadd.f32 1.0, %v272_v46 }
 0x10c   :  { %v274_v53 = vmul.f32 %v273_v50, %v258_v28  ;;  %v282_v54 = vxor.u32 2147483648, %v266_v48 }
 0x10e   :  { %v279_v56 = vxor.u32 2147483648, %v274_v53  ;;  %v283_v59 = vsel %vm281_vm15, %v282_v54, %v274_v53 }
 0x110   :  { %v280_v57 = vsel %vm278_vm14, %v266_v48, %v279_v56 }
 0x111   :  { %v284_v60 = vsel %vm277_vm0, %v280_v57, %v283_v59 }
 0x112   :  { %v285_v62 = vsel %vm275_vm1, nan, %v284_v60 }
 0x113   :  { %v286_v1 = vsub.f32 1.0, %v285_v62 }
 0x115   :  { %v287_v44 = vadd.f32 %v286_v1, %v978_v29  ;;  %v772_v29 = vld [vmem:[%s1215_s4] ss:$0 sm:$0xff] }
 0x117   :  { %324 = vmatmul.f32.vlgmr.msra.gmra.mxu1 %v287_v44 }
 0x194   :  { %v325_v11 = vpop.f32.mrf.mxu1 }
 0x195   :  { %v1059_v12 = vadd.f32 %v772_v29, %v325_v11 }
 0x197   :  { %v331_v14 = vand.u32 2139095040, %v1059_v12  ;;  %v328_v19 = vand.u32 2147483647, %v1059_v12  ;;  %vm330_vm14 = vcmp.lt.s32.totalorder %v1059_v12, 0 }
 0x199   :  { %v332_v15 = vshrl.u32 %v331_v14, 23  ;;  %v335_v23 = vand.u32 8388607, %v328_v19  ;;  %vm1118_vm15 = vcmp.le.f32.partialorder %v328_v19, 0.7853982 }
 0x19b   :  { %v750_v17 = vadd.s32 4294967169, %v332_v15  ;;  %v336_v27 = vor.u32 8388608, %v335_v23 }
 0x19d   :  { %v338_v4 = vadd.s32 1, %v750_v17  ;;  %v1078_v48 = vshll.u32 %v336_v27, 8 }
 0x19f   :  { %vm339_vm2 = vcmp.gt.s32.totalorder %v338_v4, 0  ;;  %v377_v62 = vand.u32 65535, %v1078_v48  ;;  %v378_v1 = vshrl.u32 %v1078_v48, 16 }
 0x1a0   :  { %v340_v22 = vsel %vm339_vm2, %v338_v4, 0 }
 0x1a1   :  { %v342_v24 = vand.u32 31, %v340_v22  ;;  %v1065_v26 = vshrl.u32 %v340_v22, 5 }
 0x1a3   :  { %v343_v25 = vsub.s32 32, %v342_v24  ;;  %v345_v28 = vshll.u32 %v910_v47, %v342_v24  ;;  %v348_v30 = vshll.u32 %v911_v49, %v342_v24  ;;  %v351_v34 = vshll.u32 %v912_v52, %v342_v24 }
 0x1a4   :  { %v354_v36 = vshll.u32 %v913_v55, %v342_v24  ;;  %v357_v39 = vshll.u32 %v914_v58, %v342_v24  ;;  %vm360_vm3 = vcmp.lt.s32.totalorder %v1065_v26, 1  ;;  %vm363_vm4 = vcmp.lt.s32.totalorder %v1065_v26, 4 }
 0x1a5   :  { %v346_v31 = vshrl.u32 %v911_v49, %v343_v25  ;;  %v349_v33 = vshrl.u32 %v912_v52, %v343_v25  ;;  %v352_v35 = vshrl.u32 %v913_v55, %v343_v25  ;;  %v355_v38 = vshrl.u32 %v914_v58, %v343_v25 }
 0x1a6   :  { %v358_v40 = vshrl.u32 %v915_v61, %v343_v25  ;;  %vm362_vm5 = vcmp.lt.s32.totalorder %v1065_v26, 3  ;;  %vm361_vm6 = vcmp.lt.s32.totalorder %v1065_v26, 2  ;;  %v344_v23 = vshrl.u32 %v910_v47, %v343_v25 }
 0x1a7   :  { %v347_v41 = vor.u32 %v346_v31, %v345_v28  ;;  %v350_v42 = vor.u32 %v349_v33, %v348_v30  ;;  %v353_v37 = vor.u32 %v352_v35, %v351_v34  ;;  %v356_v43 = vor.u32 %v355_v38, %v354_v36 }
 0x1a8   :  { %v359_v46 = vor.u32 %v358_v40, %v357_v39 }
 0x1a9   :  { %v368_v50 = vsel %vm360_vm3, %v347_v41, %v350_v42  ;;  %v372_v51 = vsel %vm360_vm3, %v350_v42, %v353_v37  ;;  %v369_v53 = vsel %vm363_vm4, %v356_v43, 920167782  ;;  %v365_v20 = vsel %vm363_vm4, %v353_v37, 2102212464 }
 0x1aa   :  { %v373_v54 = vsel %vm363_vm4, %v359_v46, 1326507024  ;;  %v370_v56 = vsel %vm362_vm5, %v353_v37, %v369_v53  ;;  %v364_v33 = vsel %vm360_vm3, %v344_v23, %v347_v41  ;;  %v366_v34 = vsel %vm362_vm5, %v350_v42, %v365_v20 }
 0x1ab   :  { %v374_v57 = vsel %vm362_vm5, %v356_v43, %v373_v54  ;;  %v371_v59 = vsel %vm361_vm6, %v368_v50, %v370_v56  ;;  %v367_v25 = vsel %vm361_vm6, %v364_v33, %v366_v34  ;;  %vm471_vm3 = vweird.f32 %v1059_v12 }
 0x1ac   :  { %v375_v60 = vsel %vm361_vm6, %v372_v51, %v374_v57  ;;  %v401_v3 = vand.u32 65535, %v371_v59  ;;  %v402_v5 = vshrl.u32 %v371_v59, 16  ;;  %v421_v50 = vmul.u32 %v1078_v48, %v367_v25 }
 0x1ad   :  { %v379_v44 = vand.u32 65535, %v375_v60  ;;  %v380_v2 = vshrl.u32 %v375_v60, 16 }
 0x1ae   :  { %v404_v63 = vmul.u32 %v402_v5, %v377_v62  ;;  %v405_v8 = vmul.u32 %v401_v3, %v378_v1  ;;  %v403_v10 = vmul.u32 %v401_v3, %v377_v62  ;;  %v406_v45 = vmul.u32 %v402_v5, %v378_v1 }
 0x1af   :  { %v382_v6 = vmul.u32 %v380_v2, %v377_v62  ;;  %v383_v7 = vmul.u32 %v379_v44, %v378_v1  ;;  %v381_v9 = vmul.u32 %v379_v44, %v377_v62  ;;  %v384_v0 = vmul.u32 %v380_v2, %v378_v1 }
 0x1b0   :  { %v407_v11 = vshll.u32 %v404_v63, 16  ;;  %v409_v16 = vshll.u32 %v405_v8, 16  ;;  %v408_v30 = vshrl.u32 %v404_v63, 16  ;;  %v410_v38 = vshrl.u32 %v405_v8, 16 }
 0x1b1   :  { %v385_v29 = vshll.u32 %v382_v6, 16  ;;  %v387_v13 = vshll.u32 %v383_v7, 16  ;;  %v386_v24 = vshrl.u32 %v382_v6, 16  ;;  %v388_v35 = vshrl.u32 %v383_v7, 16 }
 0x1b2   :  { %vm411_vm8 = vc.u32 %v403_v10, %v407_v11  ;;  %v413_v17 = vadd.s32 %v407_v11, %v403_v10 }
 0x1b3   :  { %vm389_vm7 = vc.u32 %v381_v9, %v385_v29  ;;  %v391_v14 = vadd.s32 %v385_v29, %v381_v9  ;;  %v412_v4 = vsel %vm411_vm8, 1, %v916_v32 }
 0x1b4   :  { %v390_v15 = vsel %vm389_vm7, 1, %v916_v32  ;;  %v414_v22 = vadd.s32 %v412_v4, %v406_v45  ;;  %vm415_vm10 = vc.u32 %v413_v17, %v409_v16  ;;  %v417_v37 = vadd.s32 %v413_v17, %v409_v16 }
 0x1b5   :  { %v392_v18 = vadd.s32 %v390_v15, %v384_v0  ;;  %vm393_vm9 = vc.u32 %v391_v14, %v387_v13  ;;  %v416_v28 = vsel %vm415_vm10, 1, %v916_v32 }
 0x1b6   :  { %v394_v21 = vsel %vm393_vm9, 1, %v916_v32  ;;  %v418_v31 = vadd.s32 %v416_v28, %v414_v22 }
 0x1b7   :  { %v396_v27 = vadd.s32 %v394_v21, %v392_v18 }
 0x1b8   :  { %v419_v39 = vadd.s32 %v418_v31, %v408_v30 }
 0x1b9   :  { %v397_v36 = vadd.s32 %v396_v27, %v386_v24 }
 0x1ba   :  { %v420_v43 = vadd.s32 %v419_v39, %v410_v38 }
 0x1bb   :  { %v398_v40 = vadd.s32 %v397_v36, %v388_v35 }
 0x1bc   :  { %v424_v46 = vadd.s32 1, %v420_v43 }
 0x1bd   :  { %vm423_vm11 = vc.u32 %v398_v40, %v417_v37  ;;  %v422_v26 = vadd.s32 %v417_v37, %v398_v40 }
 0x1be   :  { %v425_v51 = vsel %vm423_vm11, %v424_v46, %v420_v43  ;;  %v697_v43 = vld [vmem:[#allocation8 + $0x78] sm:$0xff]  ;;  %v696_v46 = vld [vmem:[#allocation8 + $0x70] sm:$0xff] }
 0x1bf   :  { %v426_v53 = vadd.s32 %v425_v51, %v421_v50  ;;  %702 = vmatpush.msra.mxu3 %v697_v43  ;;  %v695_v50 = vld [vmem:[#allocation8 + $0x68] sm:$0xff]  ;;  %v694_v51 = vld [vmem:[#allocation8 + $0x60] sm:$0xff] }
 0x1c1   :  { %v427_v41 = vadd.s32 536870912, %v426_v53  ;;  %703 = vmatpush.msra.mxu3 %v696_v46 }
 0x1c3   :  { %v428_v54 = vshrl.u32 %v427_v41, 30  ;;  %704 = vmatpush.msra.mxu3 %v695_v50  ;;  %v692_v41 = vld [vmem:[#allocation8 + $0x50] sm:$0xff] }
 0x1c5   :  { %v429_v56 = vshll.u32 %v428_v54, 30  ;;  %v452_v16 = vsub.s32 4, %v428_v54  ;;  %705 = vmatpush.msra.mxu3 %v694_v51 }
 0x1c7   :  { %v430_v42 = vsub.s32 %v426_v53, %v429_v56  ;;  %v453_v21 = vsel %vm330_vm14, %v452_v16, %v428_v54  ;;  %v693_v53 = vld [vmem:[#allocation8 + $0x58] sm:$0xff]  ;;  %v691_v54 = vld [vmem:[#allocation8 + $0x48] sm:$0xff]  ;;  %v690_v56 = vld [vmem:[#allocation8 + $0x40] sm:$0xff] }
 0x1c8   :  { %v455_v19 = vsel %vm1118_vm15, 0, %v453_v21  ;;  %706 = vmatpush.msra.mxu3 %v693_v53 }
 0x1c9   :  { %vm431_vm12 = vcmp.lt.s32.totalorder %v430_v42, 0  ;;  %v432_v57 = vsub.s32 0, %v430_v42  ;;  %v472_v31 = vand.u32 3, %v455_v19 }
 0x1ca   :  { %707 = vmatpush.msra.mxu3 %v692_v41 }
 0x1cb   :  { %v433_v59 = vsel %vm431_vm12, %v432_v57, %v430_v42  ;;  %vm474_vm0 = vcmp.eq.s32.totalorder %v472_v31, 0  ;;  %vm477_vm1 = vcmp.eq.s32.totalorder %v472_v31, 2  ;;  %vm473_vm2 = vcmp.lt.s32.totalorder %v472_v31, 2  ;;  %v688_v57 = vld [vmem:[#allocation8 + $0x30] sm:$0xff] }
 0x1cc   :  { %v434_v60 = vclz %v433_v59  ;;  %708 = vmatpush.msra.mxu3 %v691_v54 }
 0x1ce   :  { %v751_v62 = vadd.s32 4294967294, %v434_v60  ;;  %709 = vmatpush.msra.mxu3 %v690_v56 }
 0x1d0   :  { %vm752_vm13 = vcmp.lt.s32.totalorder %v751_v62, 0 }
 0x1d1   :  { %v437_v1 = vsel %vm752_vm13, 0, %v751_v62  ;;  %v687_v62 = vld [vmem:[#allocation8 + $0x28] sm:$0xff] }
 0x1d2   :  { %v438_v44 = vsub.s32 32, %v437_v1  ;;  %v442_v2 = vsub.s32 4294967266, %v437_v1  ;;  %v439_v3 = vshll.u32 %v430_v42, %v437_v1  ;;  %v689_v42 = vld [vmem:[#allocation8 + $0x38] sm:$0xff] }
 0x1d3   :  { %710 = vmatpush.msra.mxu3 %v689_v42 }
 0x1d4   :  { %v440_v5 = vshrl.u32 %v422_v26, %v438_v44  ;;  %v443_v6 = vadd.s32 127, %v442_v2  ;;  %v686_v26 = vld [vmem:[#allocation8 + $0x20] sm:$0xff]  ;;  %v685_v2 = vld [vmem:[#allocation8 + $0x18] sm:$0xff] }
 0x1d5   :  { %711 = vmatpush.msra.mxu3 %v688_v57 }
 0x1d6   :  { %v441_v48 = vor.u32 %v440_v5, %v439_v3  ;;  %v444_v7 = vshll.u32 %v443_v6, 23  ;;  %v684_v5 = vld [vmem:[#allocation8 + $0x10] sm:$0xff] }
 0x1d7   :  { %712 = vmatpush.msra.mxu3 %v687_v62 }
 0x1d8   :  { %v445_v63 = vor.u32 4788187, %v444_v7  ;;  %v448_v9 = vcvt.s32.f32 %v441_v48  ;;  %v683_v7 = vld [vmem:[#allocation8 + $0x8] sm:$0xff] }
 0x1d9   :  { %713 = vmatpush.msra.mxu3 %v686_v26 }
 0x1da   :  { %v446_v8 = vand.u32 2147483647, %v445_v63  ;;  %v682_v63 = vld [vmem:[#allocation8] sm:$0xff] }
 0x1db   :  { %714 = vmatpush.msra.mxu3 %v685_v2 }
 0x1dc   :  { %v449_v29 = vmul.f32 %v448_v9, %v446_v8 }
 0x1dd   :  { %715 = vmatpush.msra.mxu3 %v684_v5 }
 0x1de   :  { %v450_v0 = vxor.u32 2147483648, %v449_v29 }
 0x1df   :  { %716 = vmatpush.msra.mxu3 %v683_v7 }
 0x1e0   :  { %v451_v11 = vsel %vm330_vm14, %v450_v0, %v449_v29 }
 0x1e1   :  { %v454_v13 = vsel %vm1118_vm15, %v1059_v12, %v451_v11  ;;  %717 = vmatpush.msra.mxu3 %v682_v63 }
 0x1e2   :  { %v456_v14 = vmul.f32 %v454_v13, %v454_v13 }
 0x1e4   :  { %v457_v45 = vmul.f32 -0.001358992, %v456_v14  ;;  %v464_v15 = vmul.f32 -0.00019511016, %v456_v14 }
 0x1e6   :  { %v458_v17 = vadd.f32 0.041655596, %v457_v45  ;;  %v465_v18 = vadd.f32 0.008332121, %v464_v15 }
 0x1e8   :  { %v459_v4 = vmul.f32 %v458_v17, %v456_v14  ;;  %v466_v20 = vmul.f32 %v465_v18, %v456_v14 }
 0x1ea   :  { %v460_v22 = vadd.f32 -0.4999988, %v459_v4  ;;  %v467_v23 = vadd.f32 -0.16666654, %v466_v20 }
 0x1ec   :  { %v461_v24 = vmul.f32 %v460_v22, %v456_v14  ;;  %v468_v27 = vmul.f32 %v467_v23, %v456_v14 }
 0x1ee   :  { %v462_v28 = vadd.f32 1.0, %v461_v24  ;;  %v469_v30 = vadd.f32 1.0, %v468_v27 }
 0x1f0   :  { %v470_v33 = vmul.f32 %v469_v30, %v454_v13  ;;  %v478_v34 = vxor.u32 2147483648, %v462_v28 }
 0x1f2   :  { %v475_v35 = vxor.u32 2147483648, %v470_v33  ;;  %v479_v38 = vsel %vm477_vm1, %v478_v34, %v470_v33 }
 0x1f4   :  { %v476_v36 = vsel %vm474_vm0, %v462_v28, %v475_v35 }
 0x1f5   :  { %v480_v39 = vsel %vm473_vm2, %v476_v36, %v479_v38 }
 0x1f6   :  { %v481_v40 = vsel %vm471_vm3, nan, %v480_v39 }
 0x1f7   :  { %v482_v37 = vsub.f32 1.0, %v481_v40 }
 0x1f9   :  { %v483_v25 = vadd.f32 %v482_v37, %v1059_v12  ;;  %v773_v12 = vld [vmem:[%s1215_s4 + $0x1] ss:$0 sm:$0xff] }
 0x1fb   :  { %522 = vmatmul.f32.vlgmr.msra.gmra.mxu2 %v483_v25 }
 0x27e   :  { %v523_v59 = vpop.f32.mrf.mxu2 }
 0x27f   :  { %v1132_v60 = vadd.f32 %v773_v12, %v523_v59 }
 0x281   :  { %v529_v1 = vand.u32 2139095040, %v1132_v60  ;;  %v526_v6 = vand.u32 2147483647, %v1132_v60  ;;  %vm528_vm0 = vcmp.lt.s32.totalorder %v1132_v60, 0 }
 0x283   :  { %v530_v44 = vshrl.u32 %v529_v1, 23  ;;  %v533_v9 = vand.u32 8388607, %v526_v6  ;;  %vm1191_vm1 = vcmp.le.f32.partialorder %v526_v6, 0.7853982 }
 0x285   :  { %v754_v3 = vadd.s32 4294967169, %v530_v44  ;;  %v534_v11 = vor.u32 8388608, %v533_v9 }
 0x287   :  { %v536_v48 = vadd.s32 1, %v754_v3 }
 0x289   :  { %vm537_vm4 = vcmp.gt.s32.totalorder %v536_v48, 0 }
 0x28a   :  { %v538_v8 = vsel %vm537_vm4, %v536_v48, 0 }
 0x28b   :  { %v540_v29 = vand.u32 31, %v538_v8  ;;  %v1138_v10 = vshrl.u32 %v538_v8, 5 }
 0x28d   :  { %v541_v0 = vsub.s32 32, %v540_v29  ;;  %v543_v13 = vshll.u32 %v910_v47, %v540_v29  ;;  %v546_v14 = vshll.u32 %v911_v49, %v540_v29  ;;  %v549_v16 = vshll.u32 %v912_v52, %v540_v29 }
 0x28e   :  { %v552_v18 = vshll.u32 %v913_v55, %v540_v29  ;;  %v555_v20 = vshll.u32 %v914_v58, %v540_v29  ;;  %vm558_vm5 = vcmp.lt.s32.totalorder %v1138_v10, 1  ;;  %vm561_vm6 = vcmp.lt.s32.totalorder %v1138_v10, 4 }
 0x28f   :  { %v544_v45 = vshrl.u32 %v911_v49, %v541_v0  ;;  %v547_v15 = vshrl.u32 %v912_v52, %v541_v0  ;;  %v550_v17 = vshrl.u32 %v913_v55, %v541_v0  ;;  %v553_v4 = vshrl.u32 %v914_v58, %v541_v0 }
 0x290   :  { %v556_v21 = vshrl.u32 %v915_v61, %v541_v0  ;;  %v1151_v49 = vshll.u32 %v534_v11, 8  ;;  %vm560_vm7 = vcmp.lt.s32.totalorder %v1138_v10, 3  ;;  %vm559_vm8 = vcmp.lt.s32.totalorder %v1138_v10, 2 }
 0x291   :  { %v545_v22 = vor.u32 %v544_v45, %v543_v13  ;;  %v548_v23 = vor.u32 %v547_v15, %v546_v14  ;;  %v551_v19 = vor.u32 %v550_v17, %v549_v16  ;;  %v554_v24 = vor.u32 %v553_v4, %v552_v18 }
 0x292   :  { %v557_v27 = vor.u32 %v556_v21, %v555_v20  ;;  %v575_v34 = vand.u32 65535, %v1151_v49  ;;  %v576_v35 = vshrl.u32 %v1151_v49, 16  ;;  %v542_v5 = vshrl.u32 %v910_v47, %v541_v0 }
 0x293   :  { %v566_v52 = vsel %vm558_vm5, %v545_v22, %v548_v23  ;;  %v570_v55 = vsel %vm558_vm5, %v548_v23, %v551_v19  ;;  %v567_v58 = vsel %vm561_vm6, %v554_v24, 920167782  ;;  %v563_v44 = vsel %vm561_vm6, %v551_v19, 2102212464 }
 0x294   :  { %v571_v61 = vsel %vm561_vm6, %v557_v27, 1326507024  ;;  %v568_v28 = vsel %vm560_vm7, %v551_v19, %v567_v58  ;;  %v562_v29 = vsel %vm558_vm5, %v542_v5, %v545_v22  ;;  %v564_v11 = vsel %vm560_vm7, %v548_v23, %v563_v44 }
 0x295   :  { %v572_v30 = vsel %vm560_vm7, %v554_v24, %v571_v61  ;;  %v569_v31 = vsel %vm559_vm8, %v566_v52, %v568_v28  ;;  %v565_v47 = vsel %vm559_vm8, %v562_v29, %v564_v11  ;;  %vm669_vm5 = vweird.f32 %v1132_v60 }
 0x296   :  { %v573_v33 = vsel %vm559_vm8, %v570_v55, %v572_v30  ;;  %v599_v39 = vand.u32 65535, %v569_v31  ;;  %v600_v40 = vshrl.u32 %v569_v31, 16  ;;  %v619_v18 = vmul.u32 %v1151_v49, %v565_v47 }
 0x297   :  { %v577_v36 = vand.u32 65535, %v573_v33  ;;  %v578_v38 = vshrl.u32 %v573_v33, 16 }
 0x298   :  { %v602_v43 = vmul.u32 %v600_v40, %v575_v34  ;;  %v603_v46 = vmul.u32 %v599_v39, %v576_v35  ;;  %v601_v41 = vmul.u32 %v599_v39, %v575_v34  ;;  %v604_v42 = vmul.u32 %v600_v40, %v576_v35 }
 0x299   :  { %v580_v37 = vmul.u32 %v578_v38, %v575_v34  ;;  %v581_v25 = vmul.u32 %v577_v36, %v576_v35  ;;  %v579_v50 = vmul.u32 %v577_v36, %v575_v34  ;;  %v582_v53 = vmul.u32 %v578_v38, %v576_v35 }
 0x29a   :  { %v605_v54 = vshll.u32 %v602_v43, 16  ;;  %v607_v59 = vshll.u32 %v603_v46, 16  ;;  %v606_v8 = vshrl.u32 %v602_v43, 16  ;;  %v608_v45 = vshrl.u32 %v603_v46, 16 }
 0x29b   :  { %v583_v51 = vshll.u32 %v580_v37, 16  ;;  %v585_v56 = vshll.u32 %v581_v25, 16  ;;  %v584_v48 = vshrl.u32 %v580_v37, 16  ;;  %v586_v13 = vshrl.u32 %v581_v25, 16 }
 0x29c   :  { %vm609_vm10 = vc.u32 %v601_v41, %v605_v54  ;;  %v611_v62 = vadd.s32 %v605_v54, %v601_v41 }
 0x29d   :  { %vm587_vm9 = vc.u32 %v579_v50, %v583_v51  ;;  %v589_v12 = vadd.s32 %v583_v51, %v579_v50  ;;  %v610_v26 = vsel %vm609_vm10, 1, %v916_v32 }
 0x29e   :  { %v588_v57 = vsel %vm587_vm9, 1, %v916_v32  ;;  %v612_v3 = vadd.s32 %v610_v26, %v604_v42  ;;  %vm613_vm12 = vc.u32 %v611_v62, %v607_v59  ;;  %v615_v17 = vadd.s32 %v611_v62, %v607_v59 }
 0x29f   :  { %v590_v1 = vadd.s32 %v588_v57, %v582_v53  ;;  %vm591_vm11 = vc.u32 %v589_v12, %v585_v56  ;;  %v614_v63 = vsel %vm613_vm12, 1, %v916_v32 }
 0x2a0   :  { %v592_v2 = vsel %vm591_vm11, 1, %v916_v32  ;;  %v616_v9 = vadd.s32 %v614_v63, %v612_v3 }
 0x2a1   :  { %v594_v7 = vadd.s32 %v592_v2, %v590_v1 }
 0x2a2   :  { %v617_v15 = vadd.s32 %v616_v9, %v606_v8 }
 0x2a3   :  { %v595_v14 = vadd.s32 %v594_v7, %v584_v48 }
 0x2a4   :  { %v618_v0 = vadd.s32 %v617_v15, %v608_v45 }
 0x2a5   :  { %v596_v16 = vadd.s32 %v595_v14, %v586_v13  ;;  %v774_v13 = vld [vmem:[%s1217_s6] ss:$0 sm:$0xff] }
 0x2a6   :  { %v622_v32 = vadd.s32 1, %v618_v0  ;;  %v775_v14 = vld [vmem:[%s1218_s7] ss:$0 sm:$0xff] }
 0x2a7   :  { %vm621_vm13 = vc.u32 %v596_v16, %v615_v17  ;;  %v620_v10 = vadd.s32 %v615_v17, %v596_v16 }
 0x2a8   :  { %v623_v4 = vsel %vm621_vm13, %v622_v32, %v618_v0 }
 0x2a9   :  { %v624_v20 = vadd.s32 %v623_v4, %v619_v18 }
 0x2ab   :  { %v625_v21 = vadd.s32 536870912, %v624_v20 }
 0x2ad   :  { %v626_v22 = vshrl.u32 %v625_v21, 30 }
 0x2af   :  { %v627_v19 = vshll.u32 %v626_v22, 30  ;;  %v650_v53 = vsub.s32 4, %v626_v22 }
 0x2b1   :  { %v628_v23 = vsub.s32 %v624_v20, %v627_v19  ;;  %v651_v42 = vsel %vm528_vm0, %v650_v53, %v626_v22 }
 0x2b2   :  { %v653_v6 = vsel %vm1191_vm1, 0, %v651_v42 }
 0x2b3   :  { %vm629_vm14 = vcmp.lt.s32.totalorder %v628_v23, 0  ;;  %v630_v24 = vsub.s32 0, %v628_v23  ;;  %v670_v2 = vand.u32 3, %v653_v6 }
 0x2b5   :  { %v631_v27 = vsel %vm629_vm14, %v630_v24, %v628_v23  ;;  %vm672_vm2 = vcmp.eq.s32.totalorder %v670_v2, 0  ;;  %vm675_vm3 = vcmp.eq.s32.totalorder %v670_v2, 2  ;;  %vm671_vm4 = vcmp.lt.s32.totalorder %v670_v2, 2 }
 0x2b6   :  { %v632_v52 = vclz %v631_v27 }
 0x2b8   :  { %v755_v55 = vadd.s32 4294967294, %v632_v52 }
 0x2ba   :  { %vm756_vm15 = vcmp.lt.s32.totalorder %v755_v55, 0 }
 0x2bb   :  { %v635_v58 = vsel %vm756_vm15, 0, %v755_v55 }
 0x2bc   :  { %v636_v61 = vsub.s32 32, %v635_v58  ;;  %v640_v28 = vsub.s32 4294967266, %v635_v58  ;;  %v637_v30 = vshll.u32 %v628_v23, %v635_v58 }
 0x2be   :  { %v638_v31 = vshrl.u32 %v620_v10, %v636_v61  ;;  %v641_v33 = vadd.s32 127, %v640_v28 }
 0x2c0   :  { %v639_v49 = vor.u32 %v638_v31, %v637_v30  ;;  %v642_v34 = vshll.u32 %v641_v33, 23 }
 0x2c2   :  { %v643_v35 = vor.u32 4788187, %v642_v34  ;;  %v646_v38 = vcvt.s32.f32 %v639_v49 }
 0x2c4   :  { %v644_v36 = vand.u32 2147483647, %v643_v35 }
 0x2c6   :  { %v647_v39 = vmul.f32 %v646_v38, %v644_v36 }
 0x2c8   :  { %v648_v40 = vxor.u32 2147483648, %v647_v39 }
 0x2ca   :  { %v649_v25 = vsel %vm528_vm0, %v648_v40, %v647_v39 }
 0x2cb   :  { %v652_v43 = vsel %vm1191_vm1, %v1132_v60, %v649_v25 }
 0x2cc   :  { %v654_v46 = vmul.f32 %v652_v43, %v652_v43 }
 0x2ce   :  { %v655_v50 = vmul.f32 -0.001358992, %v654_v46  ;;  %v662_v51 = vmul.f32 -0.00019511016, %v654_v46 }
 0x2d0   :  { %v656_v41 = vadd.f32 0.041655596, %v655_v50  ;;  %v663_v54 = vadd.f32 0.008332121, %v662_v51 }
 0x2d2   :  { %v657_v56 = vmul.f32 %v656_v41, %v654_v46  ;;  %v664_v12 = vmul.f32 %v663_v54, %v654_v46 }
 0x2d4   :  { %v658_v57 = vadd.f32 -0.4999988, %v657_v56  ;;  %v665_v59 = vadd.f32 -0.16666654, %v664_v12 }
 0x2d6   :  { %v659_v62 = vmul.f32 %v658_v57, %v654_v46  ;;  %v666_v1 = vmul.f32 %v665_v59, %v654_v46 }
 0x2d8   :  { %v660_v26 = vadd.f32 1.0, %v659_v62  ;;  %v667_v44 = vadd.f32 1.0, %v666_v1 }
 0x2da   :  { %v668_v3 = vmul.f32 %v667_v44, %v652_v43  ;;  %v676_v5 = vxor.u32 2147483648, %v660_v26 }
 0x2dc   :  { %v673_v48 = vxor.u32 2147483648, %v668_v3  ;;  %v677_v63 = vsel %vm675_vm3, %v676_v5, %v668_v3 }
 0x2de   :  { %v674_v7 = vsel %vm672_vm2, %v660_v26, %v673_v48 }
 0x2df   :  { %v678_v8 = vsel %vm671_vm4, %v674_v7, %v677_v63 }
 0x2e0   :  { %v679_v9 = vsel %vm669_vm5, nan, %v678_v8 }
 0x2e1   :  { %v680_v29 = vsub.f32 1.0, %v679_v9 }
 0x2e3   :  { %v681_v11 = vadd.f32 %v680_v29, %v1132_v60 }
 0x2e5   :  { %718 = vmatmul.f32.vlgmr.msra.gmra.mxu3 %v681_v11 }
 0x368   :  { %v719_v45 = vpop.f32.mrf.mxu3 }
 0x369   :  { %v720_v15 = vadd.f32 %v774_v13, %v719_v45 }
 0x36b   :  { %v726_v16 = vadd.f32 %v775_v14, %v720_v15 }
 0x36d   :  { %727 = vst [vmem:[#allocation10] sm:$0xff] %v726_v16 }
 0x36e   :  { %738 = dma.vmem_to_hbm [thread:$0]  %s734_s10, 128, %s736_s13, [#allocation4]  }
 0x36f   :  { %902 = dma.done.wait [#allocation4], 128  }
 0x370   :  { %903 = vsyncadd [#allocation4], 4294967168 }
 0x371   :  { %743 = vsyncpa [#allocation3], 1 }
 0x372   :  { %744 = vsyncpa [#allocation6], 1 }
 0x373   :  { %745 = vsyncpa [#allocation9], 1 }
 0x374   :  { %746 = vsyncpa [#allocation4], 1 }

</bundles_post_ra>
